<compile_context>
chip_gen: v7x
topology: tpu7x:2x2x1
jax: 0.10.0
libtpu: 0.0.40
codegen_flags: <defaults>
</compile_context>

<pallas_src>
import numpy as np

import jax
import jax.numpy as jnp
from jax import lax
from jax.experimental import pallas as pl
from jax.experimental.pallas import tpu as pltpu

BN_EPS = 1e-5


def build_tap_tables(H: int, W: int, b_blk: int):
    """Static per-tap roll shifts and zero-padding masks for the flattened lane layout.

    The activations are laid out (C, b_blk*H*W) with lane index q = j*H*W + y*W + x.
    For tap (dy, dx) we want shifted[q] = x[q + dy*W + dx] when the neighbour is inside
    the image, else 0.  A circular jnp.roll by (-(dy*W+dx)) % N gives exactly that at
    every valid position; every wrapped position (image edge / batch boundary) is killed
    by the mask, so the circular wrap is harmless.

    Returns:
      shifts: list of 9 Python ints (jnp.roll-style shift amounts, 0 for the centre tap)
      masks:  (9, 1, b_blk*H*W) float32 0/1 edge masks
    """
    HW = H * W
    N = b_blk * HW
    p = np.arange(N) % HW
    ys, xs = p // W, p % W
    shifts, masks = [], []
    for dy in (-1, 0, 1):
        for dx in (-1, 0, 1):
            d = dy * W + dx
            shifts.append(int((-d) % N))
            valid = (ys + dy >= 0) & (ys + dy < H) & (xs + dx >= 0) & (xs + dx < W)
            masks.append(valid.astype(np.float32))
    return shifts, jnp.asarray(np.stack(masks, axis=0)[:, None, :])


def make_dpmg_kernel(C: int, shifts):
    """Kernel closure over the (static) channel count and the 9 tap shift amounts."""

    def kernel(x_ref, m_ref, w1_ref, b1_ref, w2_ref, b2_ref, w3_ref, b3_ref,
               wf_ref, bf_ref, out_ref):
        # x_ref: (C, N) activations, N = b_blk*H*W lane-dense.
        # m_ref: (9, 1, N) 0/1 edge masks.  w?_ref: (9C, C) tap-major folded conv+BN
        # weights; b?_ref: (C, 1) folded bias.  wf/bf: final 1x1 conv.  out_ref: (1, N).
        masks = [m_ref[t] for t in range(9)]            # hoisted: reused by all 3 layers

        def conv3x3_bn_relu(x, w_ref, b_ref):
            # One MXU push per layer: all 9 tap responses at once -> (9C, N).
            y = jnp.dot(w_ref[...], x, preferred_element_type=jnp.float32)
            acc = jnp.zeros_like(x)
            for t, s in enumerate(shifts):              # static unroll over the 9 taps
                y_t = y[t * C:(t + 1) * C, :]           # static sublane slice
                if s:                                   # XLU lane rotation (free slot)
                    y_t = pltpu.roll(y_t, s, axis=1)
                acc = acc + y_t * masks[t]              # VPU: zero-padding via 0/1 mask
            return jnp.maximum(acc + b_ref[...], 0.0)   # folded-BN bias + ReLU

        x = x_ref[...]
        x = conv3x3_bn_relu(x, w1_ref, b1_ref)
        x = conv3x3_bn_relu(x, w2_ref, b2_ref)
        x = conv3x3_bn_relu(x, w3_ref, b3_ref)
        out_ref[...] = (jnp.dot(wf_ref[...], x, preferred_element_type=jnp.float32)
                        + bf_ref[...])                  # final 1x1 conv (logits, no sigmoid)

    return kernel


def _fold_bn(w, b, gamma, beta, mean, var, eps=BN_EPS):
    # BatchNorm in inference mode folded into the preceding conv.
    # TODO(synk): training-mode BatchNorm (batch statistics) is not computed in-kernel.
    scale = gamma / jnp.sqrt(var + eps)                 # (C_out,)
    return w * scale[:, None, None, None], (b - mean) * scale + beta


@jax.jit
def dpmg_forward(x, params):
    B, C, H, W = x.shape
    HW = H * W

    # Block the batch: stack b_blk elements on the lane axis per grid step, and keep a
    # 2-way "parallel" grid axis whenever possible so both v7x TensorCores are used.
    n_steps = 2 if (B % 2 == 0 and B >= 2) else 1
    b_blk = B // n_steps
    N = b_blk * HW

    shifts, masks = build_tap_tables(H, W, b_blk)
    kernel = make_dpmg_kernel(C, shifts)

    def prep(layer):
        w_f, b_f = _fold_bn(layer["w"], layer["b"], layer["gamma"], layer["beta"],
                            layer["mean"], layer["var"])
        # Tap-major (9C, C): row t*C + o holds folded w[o, :, dy+1, dx+1], t = (dy+1)*3+(dx+1)
        w_all = jnp.transpose(w_f, (2, 3, 0, 1)).reshape(9 * C, C)
        return w_all, b_f.reshape(C, 1)

    w1, b1 = prep(params["layer1"])
    w2, b2 = prep(params["layer2"])
    w3, b3 = prep(params["layer3"])
    wf = params["final_w"].reshape(1, C)
    bf = params["final_b"].reshape(1, 1)

    # (B,C,H,W) -> (n_steps, C, b_blk*HW): channels on sublanes, batch*space lane-dense.
    x_steps = (x.reshape(n_steps, b_blk, C, HW)
                 .transpose(0, 2, 1, 3)
                 .reshape(n_steps, C, N))

    const2 = lambda i: (0, 0)
    const3 = lambda i: (0, 0, 0)
    out = pl.pallas_call(
        kernel,
        out_shape=jax.ShapeDtypeStruct((n_steps, 1, N), jnp.float32),
        grid=(n_steps,),
        in_specs=[
            pl.BlockSpec((pl.Squeezed(), C, N), lambda i: (i, 0, 0)),     # activations
            pl.BlockSpec((9, 1, N), const3),                              # edge masks
            pl.BlockSpec((9 * C, C), const2), pl.BlockSpec((C, 1), const2),  # layer 1
            pl.BlockSpec((9 * C, C), const2), pl.BlockSpec((C, 1), const2),  # layer 2
            pl.BlockSpec((9 * C, C), const2), pl.BlockSpec((C, 1), const2),  # layer 3
            pl.BlockSpec((1, C), const2), pl.BlockSpec((1, 1), const2),      # final 1x1
        ],
        out_specs=pl.BlockSpec((pl.Squeezed(), 1, N), lambda i: (i, 0, 0)),
        compiler_params=pltpu.CompilerParams(dimension_semantics=("parallel",)),
    )(x_steps, masks, w1, b1, w2, b2, w3, b3, wf, bf)

    return (out.reshape(n_steps, 1, b_blk, HW)
               .transpose(0, 2, 1, 3)
               .reshape(B, 1, H, W))


def dpmg_reference(x, params, eps=BN_EPS):
    """Pure-JAX reference mirroring the PyTorch forward (BN in eval mode, not folded)."""
    dn = ("NCHW", "OIHW", "NCHW")

    def block(x, layer):
        y = lax.conv_general_dilated(x, layer["w"], (1, 1), "SAME", dimension_numbers=dn)
        y = y + layer["b"][None, :, None, None]
        y = (y - layer["mean"][None, :, None, None]) * (
            layer["gamma"][None, :, None, None]
            / jnp.sqrt(layer["var"][None, :, None, None] + eps))
        y = y + layer["beta"][None, :, None, None]
        return jnp.maximum(y, 0.0)

    y = block(x, params["layer1"])
    y = block(y, params["layer2"])
    y = block(y, params["layer3"])
    y = lax.conv_general_dilated(y, params["final_w"], (1, 1), "SAME", dimension_numbers=dn)
    return y + params["final_b"][None, :, None, None]


if __name__ == "__main__":
    key = jax.random.PRNGKey(0)
    keys = jax.random.split(key, 20)
    B, C, H, W = 2, 4, 16, 16

    x = jax.random.normal(keys[0], (B, C, H, W), dtype=jnp.float32)

    def conv_init(k, c_out, c_in, kh, kw):
        kw_, kb_ = jax.random.split(k)
        bound = 1.0 / np.sqrt(c_in * kh * kw)
        w = jax.random.uniform(kw_, (c_out, c_in, kh, kw), jnp.float32, -bound, bound)
        b = jax.random.uniform(kb_, (c_out,), jnp.float32, -bound, bound)
        return w, b

    def bn_init(k, c):
        k1, k2, k3, k4 = jax.random.split(k, 4)
        return dict(
            gamma=jax.random.uniform(k1, (c,), jnp.float32, 0.5, 1.5),
            beta=0.1 * jax.random.normal(k2, (c,), dtype=jnp.float32),
            mean=0.1 * jax.random.normal(k3, (c,), dtype=jnp.float32),
            var=jax.random.uniform(k4, (c,), jnp.float32, 0.5, 1.5),
        )

    params = {}
    for i in (1, 2, 3):
        w, b = conv_init(keys[i], C, C, 3, 3)
        layer = dict(w=w, b=b)
        layer.update(bn_init(keys[10 + i], C))
        params[f"layer{i}"] = layer
    wf, bf = conv_init(keys[4], 1, C, 1, 1)
    params["final_w"], params["final_b"] = wf, bf

    out = dpmg_forward(x, params)
    out = jax.block_until_ready(out)

    ref = dpmg_reference(x, params)
    assert out.shape == (B, 1, H, W), out.shape
    max_err = float(jnp.max(jnp.abs(out - ref)))
    assert jnp.allclose(out, ref, atol=1e-3, rtol=1e-3), max_err

    print("KERNEL_OK")
</pallas_src>

<mosaic_0001>
module attributes {stable_mosaic.version = 11 : i64} {
  func.func @kernel(%arg0: i32, %arg1: memref<1x4x256xf32, #tpu.memory_space<vmem>>, %arg2: memref<9x1x256xf32, #tpu.memory_space<vmem>>, %arg3: memref<36x4xf32, #tpu.memory_space<vmem>>, %arg4: memref<4x1xf32, #tpu.memory_space<vmem>>, %arg5: memref<36x4xf32, #tpu.memory_space<vmem>>, %arg6: memref<4x1xf32, #tpu.memory_space<vmem>>, %arg7: memref<36x4xf32, #tpu.memory_space<vmem>>, %arg8: memref<4x1xf32, #tpu.memory_space<vmem>>, %arg9: memref<1x4xf32, #tpu.memory_space<vmem>>, %arg10: memref<1x1xf32, #tpu.memory_space<vmem>>, %arg11: memref<1x1x256xf32, #tpu.memory_space<vmem>>) attributes {dimension_semantics = [#tpu.dimension_semantics<parallel>], iteration_bounds = array<i64: 2>, scalar_prefetch = 0 : i64, scratch_operands = 0 : i64, tpu.core_type = #tpu.core_type<tc>, window_params = [{transform_indices = @transform_0, window_bounds = array<i64: 1, 4, 256>}, {pipeline_mode = #tpu.pipeline_mode<synchronous>, transform_indices = @transform_1, window_bounds = array<i64: 9, 1, 256>}, {pipeline_mode = #tpu.pipeline_mode<synchronous>, transform_indices = @transform_2, window_bounds = array<i64: 36, 4>}, {pipeline_mode = #tpu.pipeline_mode<synchronous>, transform_indices = @transform_3, window_bounds = array<i64: 4, 1>}, {pipeline_mode = #tpu.pipeline_mode<synchronous>, transform_indices = @transform_4, window_bounds = array<i64: 36, 4>}, {pipeline_mode = #tpu.pipeline_mode<synchronous>, transform_indices = @transform_5, window_bounds = array<i64: 4, 1>}, {pipeline_mode = #tpu.pipeline_mode<synchronous>, transform_indices = @transform_6, window_bounds = array<i64: 36, 4>}, {pipeline_mode = #tpu.pipeline_mode<synchronous>, transform_indices = @transform_7, window_bounds = array<i64: 4, 1>}, {pipeline_mode = #tpu.pipeline_mode<synchronous>, transform_indices = @transform_8, window_bounds = array<i64: 1, 4>}, {pipeline_mode = #tpu.pipeline_mode<synchronous>, transform_indices = @transform_9, window_bounds = array<i64: 1, 1>}, {transform_indices = @transform_10, window_bounds = array<i64: 1, 1, 256>}]} {
    %c0 = arith.constant 0 : index
    %c0_0 = arith.constant 0 : index
    %c0_1 = arith.constant 0 : index
    %0 = vector.load %arg2[%c0, %c0_0, %c0_1] : memref<9x1x256xf32, #tpu.memory_space<vmem>>, vector<1x1x256xf32>
    %1 = vector.shape_cast %0 : vector<1x1x256xf32> to vector<1x256xf32>
    %c1 = arith.constant 1 : index
    %c0_2 = arith.constant 0 : index
    %c0_3 = arith.constant 0 : index
    %2 = vector.load %arg2[%c1, %c0_2, %c0_3] : memref<9x1x256xf32, #tpu.memory_space<vmem>>, vector<1x1x256xf32>
    %3 = vector.shape_cast %2 : vector<1x1x256xf32> to vector<1x256xf32>
    %c2 = arith.constant 2 : index
    %c0_4 = arith.constant 0 : index
    %c0_5 = arith.constant 0 : index
    %4 = vector.load %arg2[%c2, %c0_4, %c0_5] : memref<9x1x256xf32, #tpu.memory_space<vmem>>, vector<1x1x256xf32>
    %5 = vector.shape_cast %4 : vector<1x1x256xf32> to vector<1x256xf32>
    %c3 = arith.constant 3 : index
    %c0_6 = arith.constant 0 : index
    %c0_7 = arith.constant 0 : index
    %6 = vector.load %arg2[%c3, %c0_6, %c0_7] : memref<9x1x256xf32, #tpu.memory_space<vmem>>, vector<1x1x256xf32>
    %7 = vector.shape_cast %6 : vector<1x1x256xf32> to vector<1x256xf32>
    %c4 = arith.constant 4 : index
    %c0_8 = arith.constant 0 : index
    %c0_9 = arith.constant 0 : index
    %8 = vector.load %arg2[%c4, %c0_8, %c0_9] : memref<9x1x256xf32, #tpu.memory_space<vmem>>, vector<1x1x256xf32>
    %9 = vector.shape_cast %8 : vector<1x1x256xf32> to vector<1x256xf32>
    %c5 = arith.constant 5 : index
    %c0_10 = arith.constant 0 : index
    %c0_11 = arith.constant 0 : index
    %10 = vector.load %arg2[%c5, %c0_10, %c0_11] : memref<9x1x256xf32, #tpu.memory_space<vmem>>, vector<1x1x256xf32>
    %11 = vector.shape_cast %10 : vector<1x1x256xf32> to vector<1x256xf32>
    %c6 = arith.constant 6 : index
    %c0_12 = arith.constant 0 : index
    %c0_13 = arith.constant 0 : index
    %12 = vector.load %arg2[%c6, %c0_12, %c0_13] : memref<9x1x256xf32, #tpu.memory_space<vmem>>, vector<1x1x256xf32>
    %13 = vector.shape_cast %12 : vector<1x1x256xf32> to vector<1x256xf32>
    %c7 = arith.constant 7 : index
    %c0_14 = arith.constant 0 : index
    %c0_15 = arith.constant 0 : index
    %14 = vector.load %arg2[%c7, %c0_14, %c0_15] : memref<9x1x256xf32, #tpu.memory_space<vmem>>, vector<1x1x256xf32>
    %15 = vector.shape_cast %14 : vector<1x1x256xf32> to vector<1x256xf32>
    %c8 = arith.constant 8 : index
    %c0_16 = arith.constant 0 : index
    %c0_17 = arith.constant 0 : index
    %16 = vector.load %arg2[%c8, %c0_16, %c0_17] : memref<9x1x256xf32, #tpu.memory_space<vmem>>, vector<1x1x256xf32>
    %17 = vector.shape_cast %16 : vector<1x1x256xf32> to vector<1x256xf32>
    %c0_18 = arith.constant 0 : index
    %c0_19 = arith.constant 0 : index
    %c0_20 = arith.constant 0 : index
    %18 = vector.load %arg1[%c0_18, %c0_19, %c0_20] : memref<1x4x256xf32, #tpu.memory_space<vmem>>, vector<1x4x256xf32>
    %19 = vector.shape_cast %18 : vector<1x4x256xf32> to vector<4x256xf32>
    %c0_21 = arith.constant 0 : index
    %c0_22 = arith.constant 0 : index
    %20 = vector.load %arg3[%c0_21, %c0_22] : memref<36x4xf32, #tpu.memory_space<vmem>>, vector<36x4xf32>
    %cst = arith.constant dense<0.000000e+00> : vector<36x256xf32>
    %21 = tpu.matmul %20, %19, %cst {dimension_numbers = #tpu.dot_dimension_numbers<[1], [0], [0], [1], [0, 0, 1, 1], [], []>} : vector<36x4xf32>, vector<4x256xf32>, vector<36x256xf32> -> vector<36x256xf32>
    %cst_23 = arith.constant 0.000000e+00 : f32
    %22 = vector.broadcast %cst_23 : f32 to vector<4x256xf32>
    %23 = vector.extract_strided_slice %21 {offsets = [0, 0], sizes = [4, 256], strides = [1, 1]} : vector<36x256xf32> to vector<4x256xf32>
    %c17_i32 = arith.constant 17 : i32
    %24 = tpu.dynamic_rotate %23 by %c17_i32 dim 1 : vector<4x256xf32>, i32 -> vector<4x256xf32>
    %25 = vector.broadcast %1 : vector<1x256xf32> to vector<4x256xf32>
    %26 = arith.mulf %24, %25 : vector<4x256xf32>
    %27 = arith.addf %22, %26 : vector<4x256xf32>
    %28 = vector.extract_strided_slice %21 {offsets = [4, 0], sizes = [4, 256], strides = [1, 1]} : vector<36x256xf32> to vector<4x256xf32>
    %c16_i32 = arith.constant 16 : i32
    %29 = tpu.dynamic_rotate %28 by %c16_i32 dim 1 : vector<4x256xf32>, i32 -> vector<4x256xf32>
    %30 = vector.broadcast %3 : vector<1x256xf32> to vector<4x256xf32>
    %31 = arith.mulf %29, %30 : vector<4x256xf32>
    %32 = arith.addf %27, %31 : vector<4x256xf32>
    %33 = vector.extract_strided_slice %21 {offsets = [8, 0], sizes = [4, 256], strides = [1, 1]} : vector<36x256xf32> to vector<4x256xf32>
    %c15_i32 = arith.constant 15 : i32
    %34 = tpu.dynamic_rotate %33 by %c15_i32 dim 1 : vector<4x256xf32>, i32 -> vector<4x256xf32>
    %35 = vector.broadcast %5 : vector<1x256xf32> to vector<4x256xf32>
    %36 = arith.mulf %34, %35 : vector<4x256xf32>
    %37 = arith.addf %32, %36 : vector<4x256xf32>
    %38 = vector.extract_strided_slice %21 {offsets = [12, 0], sizes = [4, 256], strides = [1, 1]} : vector<36x256xf32> to vector<4x256xf32>
    %c1_i32 = arith.constant 1 : i32
    %39 = tpu.dynamic_rotate %38 by %c1_i32 dim 1 : vector<4x256xf32>, i32 -> vector<4x256xf32>
    %40 = vector.broadcast %7 : vector<1x256xf32> to vector<4x256xf32>
    %41 = arith.mulf %39, %40 : vector<4x256xf32>
    %42 = arith.addf %37, %41 : vector<4x256xf32>
    %43 = vector.extract_strided_slice %21 {offsets = [16, 0], sizes = [4, 256], strides = [1, 1]} : vector<36x256xf32> to vector<4x256xf32>
    %44 = vector.broadcast %9 : vector<1x256xf32> to vector<4x256xf32>
    %45 = arith.mulf %43, %44 : vector<4x256xf32>
    %46 = arith.addf %42, %45 : vector<4x256xf32>
    %47 = vector.extract_strided_slice %21 {offsets = [20, 0], sizes = [4, 256], strides = [1, 1]} : vector<36x256xf32> to vector<4x256xf32>
    %c255_i32 = arith.constant 255 : i32
    %48 = tpu.dynamic_rotate %47 by %c255_i32 dim 1 : vector<4x256xf32>, i32 -> vector<4x256xf32>
    %49 = vector.broadcast %11 : vector<1x256xf32> to vector<4x256xf32>
    %50 = arith.mulf %48, %49 : vector<4x256xf32>
    %51 = arith.addf %46, %50 : vector<4x256xf32>
    %52 = vector.extract_strided_slice %21 {offsets = [24, 0], sizes = [4, 256], strides = [1, 1]} : vector<36x256xf32> to vector<4x256xf32>
    %c241_i32 = arith.constant 241 : i32
    %53 = tpu.dynamic_rotate %52 by %c241_i32 dim 1 : vector<4x256xf32>, i32 -> vector<4x256xf32>
    %54 = vector.broadcast %13 : vector<1x256xf32> to vector<4x256xf32>
    %55 = arith.mulf %53, %54 : vector<4x256xf32>
    %56 = arith.addf %51, %55 : vector<4x256xf32>
    %57 = vector.extract_strided_slice %21 {offsets = [28, 0], sizes = [4, 256], strides = [1, 1]} : vector<36x256xf32> to vector<4x256xf32>
    %c240_i32 = arith.constant 240 : i32
    %58 = tpu.dynamic_rotate %57 by %c240_i32 dim 1 : vector<4x256xf32>, i32 -> vector<4x256xf32>
    %59 = vector.broadcast %15 : vector<1x256xf32> to vector<4x256xf32>
    %60 = arith.mulf %58, %59 : vector<4x256xf32>
    %61 = arith.addf %56, %60 : vector<4x256xf32>
    %62 = vector.extract_strided_slice %21 {offsets = [32, 0], sizes = [4, 256], strides = [1, 1]} : vector<36x256xf32> to vector<4x256xf32>
    %c239_i32 = arith.constant 239 : i32
    %63 = tpu.dynamic_rotate %62 by %c239_i32 dim 1 : vector<4x256xf32>, i32 -> vector<4x256xf32>
    %64 = vector.broadcast %17 : vector<1x256xf32> to vector<4x256xf32>
    %65 = arith.mulf %63, %64 : vector<4x256xf32>
    %66 = arith.addf %61, %65 : vector<4x256xf32>
    %c0_24 = arith.constant 0 : index
    %c0_25 = arith.constant 0 : index
    %67 = vector.load %arg4[%c0_24, %c0_25] : memref<4x1xf32, #tpu.memory_space<vmem>>, vector<4x1xf32>
    %68 = vector.broadcast %67 : vector<4x1xf32> to vector<4x256xf32>
    %69 = arith.addf %66, %68 : vector<4x256xf32>
    %cst_26 = arith.constant 0.000000e+00 : f32
    %70 = vector.broadcast %cst_26 : f32 to vector<4x256xf32>
    %71 = arith.maximumf %69, %70 : vector<4x256xf32>
    %c0_27 = arith.constant 0 : index
    %c0_28 = arith.constant 0 : index
    %72 = vector.load %arg5[%c0_27, %c0_28] : memref<36x4xf32, #tpu.memory_space<vmem>>, vector<36x4xf32>
    %cst_29 = arith.constant dense<0.000000e+00> : vector<36x256xf32>
    %73 = tpu.matmul %72, %71, %cst_29 {dimension_numbers = #tpu.dot_dimension_numbers<[1], [0], [0], [1], [0, 0, 1, 1], [], []>} : vector<36x4xf32>, vector<4x256xf32>, vector<36x256xf32> -> vector<36x256xf32>
    %cst_30 = arith.constant 0.000000e+00 : f32
    %74 = vector.broadcast %cst_30 : f32 to vector<4x256xf32>
    %75 = vector.extract_strided_slice %73 {offsets = [0, 0], sizes = [4, 256], strides = [1, 1]} : vector<36x256xf32> to vector<4x256xf32>
    %c17_i32_31 = arith.constant 17 : i32
    %76 = tpu.dynamic_rotate %75 by %c17_i32_31 dim 1 : vector<4x256xf32>, i32 -> vector<4x256xf32>
    %77 = vector.broadcast %1 : vector<1x256xf32> to vector<4x256xf32>
    %78 = arith.mulf %76, %77 : vector<4x256xf32>
    %79 = arith.addf %74, %78 : vector<4x256xf32>
    %80 = vector.extract_strided_slice %73 {offsets = [4, 0], sizes = [4, 256], strides = [1, 1]} : vector<36x256xf32> to vector<4x256xf32>
    %c16_i32_32 = arith.constant 16 : i32
    %81 = tpu.dynamic_rotate %80 by %c16_i32_32 dim 1 : vector<4x256xf32>, i32 -> vector<4x256xf32>
    %82 = vector.broadcast %3 : vector<1x256xf32> to vector<4x256xf32>
    %83 = arith.mulf %81, %82 : vector<4x256xf32>
    %84 = arith.addf %79, %83 : vector<4x256xf32>
    %85 = vector.extract_strided_slice %73 {offsets = [8, 0], sizes = [4, 256], strides = [1, 1]} : vector<36x256xf32> to vector<4x256xf32>
    %c15_i32_33 = arith.constant 15 : i32
    %86 = tpu.dynamic_rotate %85 by %c15_i32_33 dim 1 : vector<4x256xf32>, i32 -> vector<4x256xf32>
    %87 = vector.broadcast %5 : vector<1x256xf32> to vector<4x256xf32>
    %88 = arith.mulf %86, %87 : vector<4x256xf32>
    %89 = arith.addf %84, %88 : vector<4x256xf32>
    %90 = vector.extract_strided_slice %73 {offsets = [12, 0], sizes = [4, 256], strides = [1, 1]} : vector<36x256xf32> to vector<4x256xf32>
    %c1_i32_34 = arith.constant 1 : i32
    %91 = tpu.dynamic_rotate %90 by %c1_i32_34 dim 1 : vector<4x256xf32>, i32 -> vector<4x256xf32>
    %92 = vector.broadcast %7 : vector<1x256xf32> to vector<4x256xf32>
    %93 = arith.mulf %91, %92 : vector<4x256xf32>
    %94 = arith.addf %89, %93 : vector<4x256xf32>
    %95 = vector.extract_strided_slice %73 {offsets = [16, 0], sizes = [4, 256], strides = [1, 1]} : vector<36x256xf32> to vector<4x256xf32>
    %96 = vector.broadcast %9 : vector<1x256xf32> to vector<4x256xf32>
    %97 = arith.mulf %95, %96 : vector<4x256xf32>
    %98 = arith.addf %94, %97 : vector<4x256xf32>
    %99 = vector.extract_strided_slice %73 {offsets = [20, 0], sizes = [4, 256], strides = [1, 1]} : vector<36x256xf32> to vector<4x256xf32>
    %c255_i32_35 = arith.constant 255 : i32
    %100 = tpu.dynamic_rotate %99 by %c255_i32_35 dim 1 : vector<4x256xf32>, i32 -> vector<4x256xf32>
    %101 = vector.broadcast %11 : vector<1x256xf32> to vector<4x256xf32>
    %102 = arith.mulf %100, %101 : vector<4x256xf32>
    %103 = arith.addf %98, %102 : vector<4x256xf32>
    %104 = vector.extract_strided_slice %73 {offsets = [24, 0], sizes = [4, 256], strides = [1, 1]} : vector<36x256xf32> to vector<4x256xf32>
    %c241_i32_36 = arith.constant 241 : i32
    %105 = tpu.dynamic_rotate %104 by %c241_i32_36 dim 1 : vector<4x256xf32>, i32 -> vector<4x256xf32>
    %106 = vector.broadcast %13 : vector<1x256xf32> to vector<4x256xf32>
    %107 = arith.mulf %105, %106 : vector<4x256xf32>
    %108 = arith.addf %103, %107 : vector<4x256xf32>
    %109 = vector.extract_strided_slice %73 {offsets = [28, 0], sizes = [4, 256], strides = [1, 1]} : vector<36x256xf32> to vector<4x256xf32>
    %c240_i32_37 = arith.constant 240 : i32
    %110 = tpu.dynamic_rotate %109 by %c240_i32_37 dim 1 : vector<4x256xf32>, i32 -> vector<4x256xf32>
    %111 = vector.broadcast %15 : vector<1x256xf32> to vector<4x256xf32>
    %112 = arith.mulf %110, %111 : vector<4x256xf32>
    %113 = arith.addf %108, %112 : vector<4x256xf32>
    %114 = vector.extract_strided_slice %73 {offsets = [32, 0], sizes = [4, 256], strides = [1, 1]} : vector<36x256xf32> to vector<4x256xf32>
    %c239_i32_38 = arith.constant 239 : i32
    %115 = tpu.dynamic_rotate %114 by %c239_i32_38 dim 1 : vector<4x256xf32>, i32 -> vector<4x256xf32>
    %116 = vector.broadcast %17 : vector<1x256xf32> to vector<4x256xf32>
    %117 = arith.mulf %115, %116 : vector<4x256xf32>
    %118 = arith.addf %113, %117 : vector<4x256xf32>
    %c0_39 = arith.constant 0 : index
    %c0_40 = arith.constant 0 : index
    %119 = vector.load %arg6[%c0_39, %c0_40] : memref<4x1xf32, #tpu.memory_space<vmem>>, vector<4x1xf32>
    %120 = vector.broadcast %119 : vector<4x1xf32> to vector<4x256xf32>
    %121 = arith.addf %118, %120 : vector<4x256xf32>
    %cst_41 = arith.constant 0.000000e+00 : f32
    %122 = vector.broadcast %cst_41 : f32 to vector<4x256xf32>
    %123 = arith.maximumf %121, %122 : vector<4x256xf32>
    %c0_42 = arith.constant 0 : index
    %c0_43 = arith.constant 0 : index
    %124 = vector.load %arg7[%c0_42, %c0_43] : memref<36x4xf32, #tpu.memory_space<vmem>>, vector<36x4xf32>
    %cst_44 = arith.constant dense<0.000000e+00> : vector<36x256xf32>
    %125 = tpu.matmul %124, %123, %cst_44 {dimension_numbers = #tpu.dot_dimension_numbers<[1], [0], [0], [1], [0, 0, 1, 1], [], []>} : vector<36x4xf32>, vector<4x256xf32>, vector<36x256xf32> -> vector<36x256xf32>
    %cst_45 = arith.constant 0.000000e+00 : f32
    %126 = vector.broadcast %cst_45 : f32 to vector<4x256xf32>
    %127 = vector.extract_strided_slice %125 {offsets = [0, 0], sizes = [4, 256], strides = [1, 1]} : vector<36x256xf32> to vector<4x256xf32>
    %c17_i32_46 = arith.constant 17 : i32
    %128 = tpu.dynamic_rotate %127 by %c17_i32_46 dim 1 : vector<4x256xf32>, i32 -> vector<4x256xf32>
    %129 = vector.broadcast %1 : vector<1x256xf32> to vector<4x256xf32>
    %130 = arith.mulf %128, %129 : vector<4x256xf32>
    %131 = arith.addf %126, %130 : vector<4x256xf32>
    %132 = vector.extract_strided_slice %125 {offsets = [4, 0], sizes = [4, 256], strides = [1, 1]} : vector<36x256xf32> to vector<4x256xf32>
    %c16_i32_47 = arith.constant 16 : i32
    %133 = tpu.dynamic_rotate %132 by %c16_i32_47 dim 1 : vector<4x256xf32>, i32 -> vector<4x256xf32>
    %134 = vector.broadcast %3 : vector<1x256xf32> to vector<4x256xf32>
    %135 = arith.mulf %133, %134 : vector<4x256xf32>
    %136 = arith.addf %131, %135 : vector<4x256xf32>
    %137 = vector.extract_strided_slice %125 {offsets = [8, 0], sizes = [4, 256], strides = [1, 1]} : vector<36x256xf32> to vector<4x256xf32>
    %c15_i32_48 = arith.constant 15 : i32
    %138 = tpu.dynamic_rotate %137 by %c15_i32_48 dim 1 : vector<4x256xf32>, i32 -> vector<4x256xf32>
    %139 = vector.broadcast %5 : vector<1x256xf32> to vector<4x256xf32>
    %140 = arith.mulf %138, %139 : vector<4x256xf32>
    %141 = arith.addf %136, %140 : vector<4x256xf32>
    %142 = vector.extract_strided_slice %125 {offsets = [12, 0], sizes = [4, 256], strides = [1, 1]} : vector<36x256xf32> to vector<4x256xf32>
    %c1_i32_49 = arith.constant 1 : i32
    %143 = tpu.dynamic_rotate %142 by %c1_i32_49 dim 1 : vector<4x256xf32>, i32 -> vector<4x256xf32>
    %144 = vector.broadcast %7 : vector<1x256xf32> to vector<4x256xf32>
    %145 = arith.mulf %143, %144 : vector<4x256xf32>
    %146 = arith.addf %141, %145 : vector<4x256xf32>
    %147 = vector.extract_strided_slice %125 {offsets = [16, 0], sizes = [4, 256], strides = [1, 1]} : vector<36x256xf32> to vector<4x256xf32>
    %148 = vector.broadcast %9 : vector<1x256xf32> to vector<4x256xf32>
    %149 = arith.mulf %147, %148 : vector<4x256xf32>
    %150 = arith.addf %146, %149 : vector<4x256xf32>
    %151 = vector.extract_strided_slice %125 {offsets = [20, 0], sizes = [4, 256], strides = [1, 1]} : vector<36x256xf32> to vector<4x256xf32>
    %c255_i32_50 = arith.constant 255 : i32
    %152 = tpu.dynamic_rotate %151 by %c255_i32_50 dim 1 : vector<4x256xf32>, i32 -> vector<4x256xf32>
    %153 = vector.broadcast %11 : vector<1x256xf32> to vector<4x256xf32>
    %154 = arith.mulf %152, %153 : vector<4x256xf32>
    %155 = arith.addf %150, %154 : vector<4x256xf32>
    %156 = vector.extract_strided_slice %125 {offsets = [24, 0], sizes = [4, 256], strides = [1, 1]} : vector<36x256xf32> to vector<4x256xf32>
    %c241_i32_51 = arith.constant 241 : i32
    %157 = tpu.dynamic_rotate %156 by %c241_i32_51 dim 1 : vector<4x256xf32>, i32 -> vector<4x256xf32>
    %158 = vector.broadcast %13 : vector<1x256xf32> to vector<4x256xf32>
    %159 = arith.mulf %157, %158 : vector<4x256xf32>
    %160 = arith.addf %155, %159 : vector<4x256xf32>
    %161 = vector.extract_strided_slice %125 {offsets = [28, 0], sizes = [4, 256], strides = [1, 1]} : vector<36x256xf32> to vector<4x256xf32>
    %c240_i32_52 = arith.constant 240 : i32
    %162 = tpu.dynamic_rotate %161 by %c240_i32_52 dim 1 : vector<4x256xf32>, i32 -> vector<4x256xf32>
    %163 = vector.broadcast %15 : vector<1x256xf32> to vector<4x256xf32>
    %164 = arith.mulf %162, %163 : vector<4x256xf32>
    %165 = arith.addf %160, %164 : vector<4x256xf32>
    %166 = vector.extract_strided_slice %125 {offsets = [32, 0], sizes = [4, 256], strides = [1, 1]} : vector<36x256xf32> to vector<4x256xf32>
    %c239_i32_53 = arith.constant 239 : i32
    %167 = tpu.dynamic_rotate %166 by %c239_i32_53 dim 1 : vector<4x256xf32>, i32 -> vector<4x256xf32>
    %168 = vector.broadcast %17 : vector<1x256xf32> to vector<4x256xf32>
    %169 = arith.mulf %167, %168 : vector<4x256xf32>
    %170 = arith.addf %165, %169 : vector<4x256xf32>
    %c0_54 = arith.constant 0 : index
    %c0_55 = arith.constant 0 : index
    %171 = vector.load %arg8[%c0_54, %c0_55] : memref<4x1xf32, #tpu.memory_space<vmem>>, vector<4x1xf32>
    %172 = vector.broadcast %171 : vector<4x1xf32> to vector<4x256xf32>
    %173 = arith.addf %170, %172 : vector<4x256xf32>
    %cst_56 = arith.constant 0.000000e+00 : f32
    %174 = vector.broadcast %cst_56 : f32 to vector<4x256xf32>
    %175 = arith.maximumf %173, %174 : vector<4x256xf32>
    %c0_57 = arith.constant 0 : index
    %c0_58 = arith.constant 0 : index
    %176 = vector.load %arg9[%c0_57, %c0_58] : memref<1x4xf32, #tpu.memory_space<vmem>>, vector<1x4xf32>
    %cst_59 = arith.constant dense<0.000000e+00> : vector<1x256xf32>
    %177 = tpu.matmul %176, %175, %cst_59 {dimension_numbers = #tpu.dot_dimension_numbers<[1], [0], [0], [1], [0, 0, 1, 1], [], []>} : vector<1x4xf32>, vector<4x256xf32>, vector<1x256xf32> -> vector<1x256xf32>
    %c0_60 = arith.constant 0 : index
    %c0_61 = arith.constant 0 : index
    %178 = vector.load %arg10[%c0_60, %c0_61] : memref<1x1xf32, #tpu.memory_space<vmem>>, vector<1x1xf32>
    %179 = vector.broadcast %178 : vector<1x1xf32> to vector<1x256xf32>
    %180 = arith.addf %177, %179 : vector<1x256xf32>
    %c0_62 = arith.constant 0 : index
    %c0_63 = arith.constant 0 : index
    %c0_64 = arith.constant 0 : index
    %181 = vector.load %arg11[%c0_62, %c0_63, %c0_64] : memref<1x1x256xf32, #tpu.memory_space<vmem>>, vector<1x1x256xf32>
    %182 = vector.shape_cast %181 : vector<1x1x256xf32> to vector<1x256xf32>
    %183 = vector.shape_cast %180 : vector<1x256xf32> to vector<1x1x256xf32>
    tpu.vector_store %arg11[%c0_62, %c0_63, %c0_64], %183 {strides = array<i32>} : memref<1x1x256xf32, #tpu.memory_space<vmem>>, vector<1x1x256xf32>,
    return
  }
  func.func @transform_0(%arg0: i32) -> (i32, i32, i32) {
    %c0_i32 = arith.constant 0 : i32
    %c0_i32_0 = arith.constant 0 : i32
    %c0_i32_1 = arith.constant 0 : i32
    return %arg0, %c0_i32, %c0_i32_0 : i32, i32, i32
  }
  func.func @transform_1(%arg0: i32) -> (i32, i32, i32) {
    %c0_i32 = arith.constant 0 : i32
    %c0_i32_0 = arith.constant 0 : i32
    %c0_i32_1 = arith.constant 0 : i32
    %c0_i32_2 = arith.constant 0 : i32
    return %c0_i32, %c0_i32_0, %c0_i32_1 : i32, i32, i32
  }
  func.func @transform_2(%arg0: i32) -> (i32, i32) {
    %c0_i32 = arith.constant 0 : i32
    %c0_i32_0 = arith.constant 0 : i32
    %c0_i32_1 = arith.constant 0 : i32
    return %c0_i32, %c0_i32_0 : i32, i32
  }
  func.func @transform_3(%arg0: i32) -> (i32, i32) {
    %c0_i32 = arith.constant 0 : i32
    %c0_i32_0 = arith.constant 0 : i32
    %c0_i32_1 = arith.constant 0 : i32
    return %c0_i32, %c0_i32_0 : i32, i32
  }
  func.func @transform_4(%arg0: i32) -> (i32, i32) {
    %c0_i32 = arith.constant 0 : i32
    %c0_i32_0 = arith.constant 0 : i32
    %c0_i32_1 = arith.constant 0 : i32
    return %c0_i32, %c0_i32_0 : i32, i32
  }
  func.func @transform_5(%arg0: i32) -> (i32, i32) {
    %c0_i32 = arith.constant 0 : i32
    %c0_i32_0 = arith.constant 0 : i32
    %c0_i32_1 = arith.constant 0 : i32
    return %c0_i32, %c0_i32_0 : i32, i32
  }
  func.func @transform_6(%arg0: i32) -> (i32, i32) {
    %c0_i32 = arith.constant 0 : i32
    %c0_i32_0 = arith.constant 0 : i32
    %c0_i32_1 = arith.constant 0 : i32
    return %c0_i32, %c0_i32_0 : i32, i32
  }
  func.func @transform_7(%arg0: i32) -> (i32, i32) {
    %c0_i32 = arith.constant 0 : i32
    %c0_i32_0 = arith.constant 0 : i32
    %c0_i32_1 = arith.constant 0 : i32
    return %c0_i32, %c0_i32_0 : i32, i32
  }
  func.func @transform_8(%arg0: i32) -> (i32, i32) {
    %c0_i32 = arith.constant 0 : i32
    %c0_i32_0 = arith.constant 0 : i32
    %c0_i32_1 = arith.constant 0 : i32
    return %c0_i32, %c0_i32_0 : i32, i32
  }
  func.func @transform_9(%arg0: i32) -> (i32, i32) {
    %c0_i32 = arith.constant 0 : i32
    %c0_i32_0 = arith.constant 0 : i32
    %c0_i32_1 = arith.constant 0 : i32
    return %c0_i32, %c0_i32_0 : i32, i32
  }
  func.func @transform_10(%arg0: i32) -> (i32, i32, i32) {
    %c0_i32 = arith.constant 0 : i32
    %c0_i32_0 = arith.constant 0 : i32
    %c0_i32_1 = arith.constant 0 : i32
    return %arg0, %c0_i32, %c0_i32_0 : i32, i32, i32
  }
}

</mosaic_0001>

<bundles_post_ra>
// kernel: dpmg_forward.1
= control target key start
LH: loop header
LB: loop body
LE: loop exit
PB: predicated region body
PF: predicated region fallthrough
CT: control target
= control target key end

     0   :  { %s1517_s15 = smov 0   ;;  %s1971_s0 = inlined_call_operand.vmem [shape: f32[2,4,256], index: 0, kind: input, shape index: {}]   ;;  %s1972_s1 = inlined_call_operand.vmem [shape: f32[9,1,256], index: 1, kind: input, shape index: {}]   ;;  %s1973_s2 = inlined_call_operand.vmem [shape: f32[36,4], index: 2, kind: input, shape index: {}]   ;;  %s1974_s3 = inlined_call_operand.vmem [shape: f32[4,1], index: 3, kind: input, shape index: {}]   ;;  %s1975_s4 = inlined_call_operand.vmem [shape: f32[36,4], index: 4, kind: input, shape index: {}]   ;;  %s1976_s5 = inlined_call_operand.vmem [shape: f32[4,1], index: 5, kind: input, shape index: {}]   ;;  %s1977_s6 = inlined_call_operand.vmem [shape: f32[36,4], index: 6, kind: input, shape index: {}]   ;;  %s1978_s7 = inlined_call_operand.vmem [shape: f32[4,1], index: 7, kind: input, shape index: {}]   ;;  %s1979_s8 = inlined_call_operand.vmem [shape: f32[1,4], index: 8, kind: input, shape index: {}]   ;;  %s1980_s9 = inlined_call_operand.<no memory space> [shape: f32[1,1], index: 9, kind: input, shape index: {}]   ;;  %s1981_s10 = inlined_call_operand.vmem [shape: f32[2,1,256], index: 10, kind: output, shape index: {}]  }
   0x1   :  { %v15_v0 = vstv %s1980_s9 }
   0x2   :  { %16 = vst [vmem:[#allocation2] sm:$0x1] %v15_v0 }
   0x3 LB: > { %s1373_s16 = sadd.s32 4294967295, %s1446_s15   ;;  %p1377_p0 = scmp.ge.s32.totalorder %s1446_s15, 1  ;;  %s1446_s15 = sphi %s1517_s15, %s22_s15  }
   0x4   : > { %p314_p1 = scmp.lt.s32.totalorder %s1446_s15, 3 }
   0x6   : > { %p315_p2 = pnand %p1377_p0, %p314_p1 }
   0x7   : > { %p351_p3 = scmp.lt.s32.totalorder (!%p315_p2), %s1373_s16, 1  ;;  %v1448_v1 = vmov (!%p315_p2), 0.0   ;;  %vm401_vm0 = vcmask (!%p315_p2), 1043456   ;;  %v378_v4 = vld [vmem:[%s1973_s2] sm:$0xff] (!%p315_p2)  ;;  %vm385_vm1 = vcmask (!%p315_p2), 31744   ;;  %v381_v5 = vld [vmem:[%s1973_s2 + $0x18] sm:$0xff] (!%p315_p2)  ;;  %v505_v32 = vlaneseq (!%p315_p2) }
   0x8   : > { %318 = sbr.rel (%p315_p2) target bundleno = 1353 (0x549), region = 60  ;;  %470 = vmatprep.mubr.f32.mxu0 (!%p315_p2), %v1448_v1  ;;  %488 = vmatprep.mubr.f32.mxu1 (!%p315_p2), %v1448_v1  ;;  %v379_v6 = vld [vmem:[%s1973_s2 + $0x8] sm:$0xff] (!%p315_p2)  ;;  %v382_v7 = vld [vmem:[%s1973_s2 + $0x20] sm:$0xf] (!%p315_p2)  ;;  %v380_v8 = vld [vmem:[%s1973_s2 + $0x10] sm:$0xff] (!%p315_p2)  ;;  %v1449_v9 = vmov (!%p315_p2), 0  }
   0x9   : > { %1437 = vset.pattern.permute.xlu0 (!%p315_p2), %v1449_v9  ;;  %1438 = vset.pattern.permute.xlu1 (!%p315_p2), %v1449_v9  ;;  %s1450_s30 = smov (!%p315_p2), 17   ;;  %s1451_s11 = smov (!%p315_p2), 113   ;;  %v718_v28 = vld [vmem:[%s1974_s3] sm:$0xf] (!%p315_p2)  ;;  %v1595_v35 = vshrl.u32 (!%p315_p2), %v505_v32, 7  ;;  %v1598_v37 = vand.u32 (!%p315_p2), 127, %v505_v32 }
   0xa   : > { %s1452_s12 = smov (!%p315_p2), 16   ;;  %s1453_s13 = smov (!%p315_p2), 112   ;;  %v957_v29 = vld [vmem:[%s1976_s5] sm:$0xf] (!%p315_p2)  ;;  %v1382_v44 = vld [vmem:[%s1972_s1 + $0x4] sm:$0x3] (!%p315_p2) }
   0xb   : > { %s1454_s14 = smov (!%p315_p2), 15   ;;  %s1456_s17 = smov (!%p315_p2), 127   ;;  %v360_v39 = vld [vmem:[%s1972_s1] sm:$0x3] (!%p315_p2)  ;;  %v1381_v40 = vld [vmem:[%s1972_s1 + $0x2] sm:$0x3] (!%p315_p2) }
   0xc   : > { %s1457_s20 = smov (!%p315_p2), 111   ;;  %v1607_v41 = vsub.s32 (!%p315_p2), 0, %v1595_v35  ;;  %v1610_v42 = vsub.s32 (!%p315_p2), 1, %v1595_v35  ;;  %vm507_vm2 = vcmp.lt.s32.totalorder (!%p315_p2), %v1598_v37, 17  ;;  %vm535_vm3 = vcmp.lt.s32.totalorder (!%p315_p2), %v1598_v37, 16 }
   0xd   : > { %vm557_vm4 = vcmp.lt.s32.totalorder (!%p315_p2), %v1598_v37, 15  ;;  %v1383_v57 = vld [vmem:[%s1972_s1 + $0x6] sm:$0x3] (!%p315_p2)  ;;  %v1384_v58 = vld [vmem:[%s1972_s1 + $0x8] sm:$0x3] (!%p315_p2)  ;;  %vm585_vm5 = vcmp.lt.s32.totalorder (!%p315_p2), %v1598_v37, 1 }
   0xe   : > { %v1620_v45 = vrot.slane (!%p315_p2), %v360_v39, %v1607_v41  ;;  %v1623_v46 = vrot.slane (!%p315_p2), %v360_v39, %v1610_v42  ;;  %v1626_v47 = vrot.slane (!%p315_p2), %v1381_v40, %v1607_v41  ;;  %v1629_v48 = vrot.slane (!%p315_p2), %v1381_v40, %v1610_v42 }
   0xf   : > { %s1983_s16 = smov (!%p351_p3, %s1373_s16), 1  ;;  %v1643_v54 = vrot.slane %v1382_v44, %v1607_v41  ;;  %v1646_v55 = vrot.slane %v1382_v44, %v1610_v42  ;;  %vm628_vm6 = vcmp.lt.s32.totalorder %v1598_v37, 127  ;;  %vm650_vm7 = vcmp.lt.s32.totalorder %v1598_v37, 113 }
  0x10   : > { %s1415_s9 = sshll.u32 %s1983_s16, 3  ;;  %vm678_vm8 = vcmp.lt.s32.totalorder %v1598_v37, 112  ;;  %vm700_vm9 = vcmp.lt.s32.totalorder %v1598_v37, 111  ;;  %v1206_v37 = vld [vmem:[%s1979_s8] sm:$0x1]  ;;  %vm1317_vm10 = vcmp.lt.s32.totalorder %v505_v32, 256 }
  0x11   : > { %s355_s19 = scalar_lea.vmem %s1971_s0, %s1415_s9  ;;  %s1455_s9 = smov 1  }
  0x12   : > { %v377_v2 = vld [vmem:[%s355_s19] sm:$0xff] }
  0x13   : > { %v384_v3 = vcombine.high %v377_v2, %v377_v2 }
  0x15   : > { %1389 = vmatprep.subr.msk.mxu0 %vm401_vm0, %v384_v3  ;;  %1416 = vmatprep.subr.msk.mxu1 %vm401_vm0, %v384_v3 }
  0x16   : > { %1390 = vmatpush1.msk.msra.mxu0 %vm401_vm0, %v377_v2  ;;  %1417 = vmatpush1.msk.msra.mxu1 %vm401_vm0, %v377_v2 }
  0x17   : > { %1391 = vmatmul.mubr.msk.f32.vlgmr.msra.gmra.mrb[0].mxu0 %vm385_vm1, %v378_v4  ;;  %1394 = vmatmul.mubr.msk.f32.vlgmr.msra.gmra.mrb[0].mxu1 %vm385_vm1, %v381_v5  ;;  %v1666_v5 = vrot.slane %v1383_v57, %v1607_v41 }
  0x18   : > { %476 = vmatprep.mubr.f32.mxu0 %v1448_v1  ;;  %494 = vmatprep.mubr.f32.mxu1 %v1448_v1 }
  0x1b   : > { %1392 = vmatmul.mubr.msk.f32.gmra.mrb[2].mxu0 %vm385_vm1, %v379_v6  ;;  %1395 = vmatmul.mubr.msk.f32.gmra.mrb[2].mxu1 %vm385_vm1, %v382_v7  ;;  %v1669_v6 = vrot.slane %v1383_v57, %v1610_v42  ;;  %v1385_v7 = vld [vmem:[%s1972_s1 + $0xa] sm:$0x3] }
  0x1c   : > { %482 = vmatprep.mubr.f32.mxu0 %v1448_v1  ;;  %818 = vmatprep.mubr.f32.mxu1 %v1448_v1 }
  0x1f   : > { %1393 = vmatmul.mubr.msk.f32.gmra.mrb[4].mxu0 %vm385_vm1, %v380_v8  ;;  %v1675_v8 = vrot.slane %v1384_v58, %v1607_v41 }
  0x20   : > { %1057 = vmatprep.mubr.f32.mxu0 %v1448_v1 }
  0xea   : > { %v472_v10 = vpop.f32.mrb[0].mxu0  ;;  %v490_v11 = vpop.f32.mrb[0].mxu1 }
  0xeb   : > { %v492_v12 = vpop.f32.mrb[1].mxu1  ;;  %501 = vrot.lane.b32.xlu0 %v472_v10, %s1450_s30  ;;  %v474_v13 = vpop.f32.mrb[1].mxu0  ;;  %v527_v14 = vrot.slane %v472_v10, 4  ;;  %v670_v22 = vrot.slane %v490_v11, 4  ;;  %v1678_v10 = vrot.slane %v1384_v58, %v1610_v42 }
  0xec   : > { %648 = vrot.lane.b32.xlu1 %v492_v12, %s1451_s11  ;;  %v528_v19 = vrot.slane %v474_v13, 4  ;;  %v671_v23 = vrot.slane %v492_v12, 4 }
  0xee   : > { %v478_v15 = vpop.f32.mrb[2].mxu0  ;;  %v496_v16 = vpop.f32.mrb[2].mxu1 }
  0xef   : > { %646 = vrot.lane.b32.xlu0 %v490_v11, %s1451_s11  ;;  %v480_v17 = vpop.f32.mrb[3].mxu0  ;;  %v498_v18 = vpop.f32.mrb[3].mxu1  ;;  %v577_v24 = vrot.slane %v478_v15, 4 }
  0xf0   : > { %531 = vrot.lane.b32.xlu1 %v527_v14, %s1452_s12  ;;  %v578_v25 = vrot.slane %v480_v17, 4 }
  0xf2   : > { %v1566_v20 = vpop.f32.mrb[4].mxu0 }
  0xf3   : > { %503 = vrot.lane.b32.xlu0 %v474_v13, %s1450_s30  ;;  %v1569_v21 = vpop.f32.mrb[5].mxu0  ;;  %v620_v26 = vrot.slane %v1566_v20, 4 }
  0xf4   : > { %533 = vrot.lane.b32.xlu1 %v528_v19, %s1452_s12  ;;  %v621_v27 = vrot.slane %v1569_v21, 4 }
  0xf7   : > { %674 = vrot.lane.b32.xlu0 %v670_v22, %s1453_s13 }
  0xf8   : > { %676 = vrot.lane.b32.xlu1 %v671_v23, %s1453_s13 }
  0xfb   : > { %553 = vrot.lane.b32.xlu0 %v478_v15, %s1454_s14 }
  0xfc   : > { %555 = vrot.lane.b32.xlu1 %v480_v17, %s1454_s14  ;;  %v1689_v17 = vrot.slane %v1385_v7, %v1610_v42 }
  0xff   : > { %581 = vrot.lane.b32.xlu0 %v577_v24, %s1455_s9 }
 0x100   : > { %583 = vrot.lane.b32.xlu1 %v578_v25, %s1455_s9  ;;  %v614_v25 = vmul.f32 %v1675_v8, %v1566_v20 }
 0x103   : > { %624 = vrot.lane.b32.xlu0 %v620_v26, %s1456_s17  ;;  %v615_v26 = vmul.f32 %v1678_v10, %v1569_v21 }
 0x104   : > { %626 = vrot.lane.b32.xlu1 %v621_v27, %s1456_s17  ;;  %v1386_v27 = vld [vmem:[%s1972_s1 + $0xc] sm:$0x3] }
 0x105   : > { %v1708_v40 = vrot.slane %v1386_v27, %v1607_v41  ;;  %v1711_v44 = vrot.slane %v1386_v27, %v1610_v42  ;;  %v730_v27 = vld [vmem:[%s1975_s4 + $0x10] sm:$0xff] }
 0x107   : > { %721 = vperm.xlu0 %1437, %v718_v28  }
 0x108   : > { %696 = vrot.lane.b32.xlu1 %v496_v16, %s1457_s20  ;;  %v1686_v16 = vrot.slane %v1385_v7, %v1607_v41 }
 0x10b   : > { %960 = vperm.xlu0 %1437, %v957_v29  }
 0x10c   : > { %698 = vrot.lane.b32.xlu1 %v498_v18, %s1457_s20 }
 0x15d   : > { %v502_v30 = vpop.permute.xlu0 %501 }
 0x15e   : > { %v1590_v31 = vpop.permute.xlu1 %648 }
 0x161   : > { %v1592_v33 = vpop.permute.xlu0 %646 }
 0x162   : > { %v532_v34 = vpop.permute.xlu1 %531 }
 0x165   : > { %v504_v36 = vpop.permute.xlu0 %503 }
 0x166   : > { %v534_v38 = vpop.permute.xlu1 %533  ;;  %v508_v50 = vsel %vm507_vm2, %v502_v30, %v504_v36  ;;  %v509_v51 = vsel %vm507_vm2, %v504_v36, %v502_v30 }
 0x167   : > { %v536_v52 = vsel %vm535_vm3, %v532_v34, %v534_v38  ;;  %v537_v53 = vsel %vm535_vm3, %v534_v38, %v532_v34  ;;  %v521_v59 = vmul.f32 %v1620_v45, %v509_v51  ;;  %v522_v60 = vmul.f32 %v1623_v46, %v508_v50  ;;  %v1387_v50 = vld [vmem:[%s1972_s1 + $0xe] sm:$0x3] }
 0x168   : > { %v549_v61 = vmul.f32 %v1626_v47, %v537_v53  ;;  %v550_v62 = vmul.f32 %v1629_v48, %v536_v52  ;;  %v651_v51 = vsel %vm650_vm7, %v1592_v33, %v1590_v31  ;;  %v652_v52 = vsel %vm650_vm7, %v1590_v31, %v1592_v33 }
 0x169   : > { %v1614_v43 = vpop.permute.xlu0 %674  ;;  %v665_v31 = vmul.f32 %v1711_v44, %v652_v52 }
 0x16a   : > { %v1631_v49 = vpop.permute.xlu1 %676  ;;  %v551_v11 = vadd.f32 %v549_v61, %v521_v59  ;;  %v552_v12 = vadd.f32 %v550_v62, %v522_v60  ;;  %v1729_v59 = vrot.slane %v1387_v50, %v1607_v41  ;;  %v1732_v60 = vrot.slane %v1387_v50, %v1610_v42 }
 0x16b   : > { %v664_v61 = vmul.f32 %v1708_v40, %v651_v51 }
 0x16d   : > { %v554_v56 = vpop.permute.xlu0 %553 }
 0x16e   : > { %v556_v63 = vpop.permute.xlu1 %555 }
 0x16f   : > { %v558_v0 = vsel %vm557_vm4, %v554_v56, %v556_v63  ;;  %v559_v2 = vsel %vm557_vm4, %v556_v63, %v554_v56  ;;  %v1388_v56 = vld [vmem:[%s1972_s1 + $0x10] sm:$0x3]  ;;  %v679_v63 = vsel %vm678_vm8, %v1614_v43, %v1631_v49 }
 0x170   : > { %v571_v3 = vmul.f32 %v1643_v54, %v559_v2  ;;  %v572_v4 = vmul.f32 %v1646_v55, %v558_v0  ;;  %v1738_v33 = vrot.slane %v1388_v56, %v1607_v41  ;;  %v1741_v62 = vrot.slane %v1388_v56, %v1610_v42 }
 0x171   : > { %v582_v9 = vpop.permute.xlu0 %581  ;;  %v680_v0 = vsel %vm678_vm8, %v1631_v49, %v1614_v43 }
 0x172   : > { %v584_v13 = vpop.permute.xlu1 %583  ;;  %v573_v18 = vadd.f32 %v571_v3, %v551_v11  ;;  %v574_v19 = vadd.f32 %v572_v4, %v552_v12  ;;  %v693_v11 = vmul.f32 %v1732_v60, %v680_v0 }
 0x173   : > { %v586_v14 = vsel %vm585_vm5, %v582_v9, %v584_v13  ;;  %v587_v15 = vsel %vm585_vm5, %v584_v13, %v582_v9  ;;  %v692_v9 = vmul.f32 %v1729_v59, %v679_v63 }
 0x174   : > { %v599_v22 = vmul.f32 %v1666_v5, %v587_v15  ;;  %v600_v23 = vmul.f32 %v1669_v6, %v586_v14 }
 0x175   : > { %v625_v24 = vpop.permute.xlu0 %624 }
 0x176   : > { %v601_v28 = vadd.f32 %v599_v22, %v573_v18  ;;  %v602_v29 = vadd.f32 %v600_v23, %v574_v19  ;;  %v627_v30 = vpop.permute.xlu1 %626 }
 0x177   : > { %v629_v34 = vsel %vm628_vm6, %v625_v24, %v627_v30  ;;  %v630_v36 = vsel %vm628_vm6, %v627_v30, %v625_v24 }
 0x178   : > { %v616_v38 = vadd.f32 %v614_v25, %v601_v28  ;;  %v617_v20 = vadd.f32 %v615_v26, %v602_v29  ;;  %v642_v39 = vmul.f32 %v1686_v16, %v629_v34  ;;  %v643_v21 = vmul.f32 %v1689_v17, %v630_v36  ;;  %v728_v25 = vld [vmem:[%s1975_s4] sm:$0xff]  ;;  %v729_v26 = vld [vmem:[%s1975_s4 + $0x8] sm:$0xff]  ;;  %v731_v28 = vld [vmem:[%s1975_s4 + $0x18] sm:$0xff] }
 0x179   : > { %v732_v29 = vld [vmem:[%s1975_s4 + $0x20] sm:$0xf] }
 0x17a   : > { %v697_v53 = vpop.permute.xlu1 %696  ;;  %v644_v57 = vadd.f32 %v642_v39, %v616_v38  ;;  %v645_v58 = vadd.f32 %v643_v21, %v617_v20 }
 0x17c   : > { %v666_v3 = vadd.f32 %v664_v61, %v644_v57  ;;  %v667_v4 = vadd.f32 %v665_v31, %v645_v58 }
 0x17e   : > { %v699_v2 = vpop.permute.xlu1 %698  ;;  %v694_v14 = vadd.f32 %v692_v9, %v666_v3  ;;  %v695_v15 = vadd.f32 %v693_v11, %v667_v4 }
 0x17f   : > { %v701_v7 = vsel %vm700_vm9, %v697_v53, %v699_v2  ;;  %v702_v42 = vsel %vm700_vm9, %v699_v2, %v697_v53  ;;  %v1196_v2 = vld [vmem:[%s1978_s7] sm:$0xf] }
 0x180   : > { %v714_v12 = vmul.f32 %v1738_v33, %v701_v7  ;;  %v715_v13 = vmul.f32 %v1741_v62, %v702_v42 }
 0x182   : > { %v716_v43 = vadd.f32 %v714_v12, %v694_v14  ;;  %v717_v49 = vadd.f32 %v715_v13, %v695_v15 }
 0x186   : > { %v722_v18 = vpop.permute.xlu0 %721 }
 0x187   : > { %v724_v19 = vadd.f32 %v722_v18, %v716_v43  ;;  %v725_v22 = vadd.f32 %v722_v18, %v717_v49 }
 0x189   : > { %v726_v23 = vmax.f32 %v724_v19, 0.0  ;;  %v727_v24 = vmax.f32 %v725_v22, 0.0 }
 0x18a   : > { %v1805_v3 = vpop.permute.xlu0 %960 }
 0x18b   : > { %1396 = vmatprep.subr.msk.mxu1 %vm401_vm0, %v727_v24 }
 0x18c   : > { %1397 = vmatpush1.msk.msra.mxu1 %vm401_vm0, %v726_v23 }
 0x18d   : > { %1398 = vmatmul.mubr.msk.f32.vlgmr.msra.gmra.mrb[4].mxu1 %vm385_vm1, %v728_v25 }
 0x18e   : > { %824 = vmatprep.mubr.f32.mxu1 %v1448_v1 }
 0x191   : > { %1399 = vmatmul.mubr.msk.f32.gmra.mrb[6].mxu1 %vm385_vm1, %v729_v26 }
 0x192   : > { %830 = vmatprep.mubr.f32.mxu1 %v1448_v1 }
 0x195   : > { %1400 = vmatmul.mubr.msk.f32.gmra.mrb[8].mxu1 %vm385_vm1, %v730_v27 }
 0x196   : > { %836 = vmatprep.mubr.f32.mxu1 %v1448_v1 }
 0x199   : > { %1401 = vmatmul.mubr.msk.f32.gmra.mrb[10].mxu1 %vm385_vm1, %v731_v28 }
 0x19a   : > { %842 = vmatprep.mubr.f32.mxu1 %v1448_v1 }
 0x19d   : > { %1402 = vmatmul.mubr.msk.f32.gmra.mrb[12].mxu1 %vm385_vm1, %v732_v29 }
 0x19e   : > { %1290 = vmatprep.mubr.f32.mxu1 %v1448_v1 }
 0x260   : > { %v820_v30 = vpop.f32.mrb[4].mxu1 }
 0x261   : > { %849 = vrot.lane.b32.xlu0 %v820_v30, %s1450_s30  ;;  %v822_v34 = vpop.f32.mrb[5].mxu1  ;;  %v861_v36 = vrot.slane %v820_v30, 4 }
 0x262   : > { %851 = vrot.lane.b32.xlu1 %v822_v34, %s1450_s30  ;;  %v862_v38 = vrot.slane %v822_v34, 4 }
 0x264   : > { %v826_v20 = vpop.f32.mrb[6].mxu1 }
 0x265   : > { %865 = vrot.lane.b32.xlu0 %v861_v36, %s1452_s12  ;;  %v828_v39 = vpop.f32.mrb[7].mxu1  ;;  %v887_v51 = vrot.slane %v826_v20, 4 }
 0x266   : > { %867 = vrot.lane.b32.xlu1 %v862_v38, %s1452_s12  ;;  %v888_v52 = vrot.slane %v828_v39, 4 }
 0x268   : > { %v832_v21 = vpop.f32.mrb[8].mxu1 }
 0x269   : > { %875 = vrot.lane.b32.xlu0 %v826_v20, %s1454_s14  ;;  %v834_v50 = vpop.f32.mrb[9].mxu1  ;;  %v907_v56 = vrot.slane %v832_v21, 4 }
 0x26a   : > { %877 = vrot.lane.b32.xlu1 %v828_v39, %s1454_s14  ;;  %v908_v58 = vrot.slane %v834_v50, 4 }
 0x26c   : > { %v838_v53 = vpop.f32.mrb[10].mxu1 }
 0x26d   : > { %891 = vrot.lane.b32.xlu0 %v887_v51, %s1455_s9  ;;  %v840_v57 = vpop.f32.mrb[11].mxu1  ;;  %v933_v63 = vrot.slane %v838_v53, 4 }
 0x26e   : > { %893 = vrot.lane.b32.xlu1 %v888_v52, %s1455_s9  ;;  %v934_v0 = vrot.slane %v840_v57, 4 }
 0x270   : > { %v844_v61 = vpop.f32.mrb[12].mxu1 }
 0x271   : > { %911 = vrot.lane.b32.xlu0 %v907_v56, %s1456_s17  ;;  %v846_v31 = vpop.f32.mrb[13].mxu1 }
 0x272   : > { %913 = vrot.lane.b32.xlu1 %v908_v58, %s1456_s17 }
 0x275   : > { %921 = vrot.lane.b32.xlu0 %v838_v53, %s1451_s11 }
 0x276   : > { %923 = vrot.lane.b32.xlu1 %v840_v57, %s1451_s11 }
 0x279   : > { %937 = vrot.lane.b32.xlu0 %v933_v63, %s1453_s13  ;;  %v901_v63 = vmul.f32 %v832_v21, %v1675_v8 }
 0x27a   : > { %939 = vrot.lane.b32.xlu1 %v934_v0, %s1453_s13  ;;  %v902_v0 = vmul.f32 %v834_v50, %v1678_v10 }
 0x27d   : > { %949 = vrot.lane.b32.xlu0 %v846_v31, %s1457_s20 }
 0x27e   : > { %947 = vrot.lane.b32.xlu1 %v844_v61, %s1457_s20 }
 0x282   : > { %1199 = vperm.xlu1 %1438, %v1196_v2  }
 0x2d3   : > { %v850_v4 = vpop.permute.xlu0 %849 }
 0x2d4   : > { %v852_v7 = vpop.permute.xlu1 %851 }
 0x2d5   : > { %v853_v15 = vsel %vm507_vm2, %v850_v4, %v852_v7  ;;  %v854_v43 = vsel %vm507_vm2, %v852_v7, %v850_v4 }
 0x2d6   : > { %v855_v24 = vmul.f32 %v854_v43, %v1620_v45  ;;  %v856_v25 = vmul.f32 %v853_v15, %v1623_v46 }
 0x2d7   : > { %v866_v42 = vpop.permute.xlu0 %865 }
 0x2d8   : > { %v868_v9 = vpop.permute.xlu1 %867 }
 0x2d9   : > { %v869_v11 = vsel %vm535_vm3, %v866_v42, %v868_v9  ;;  %v870_v12 = vsel %vm535_vm3, %v868_v9, %v866_v42 }
 0x2da   : > { %v871_v19 = vmul.f32 %v870_v12, %v1626_v47  ;;  %v872_v22 = vmul.f32 %v869_v11, %v1629_v48 }
 0x2db   : > { %v876_v13 = vpop.permute.xlu0 %875 }
 0x2dc   : > { %v878_v14 = vpop.permute.xlu1 %877  ;;  %v873_v34 = vadd.f32 %v871_v19, %v855_v24  ;;  %v874_v36 = vadd.f32 %v872_v22, %v856_v25 }
 0x2dd   : > { %v879_v49 = vsel %vm557_vm4, %v876_v13, %v878_v14  ;;  %v880_v18 = vsel %vm557_vm4, %v878_v14, %v876_v13 }
 0x2de   : > { %v881_v26 = vmul.f32 %v880_v18, %v1643_v54  ;;  %v882_v27 = vmul.f32 %v879_v49, %v1646_v55 }
 0x2df   : > { %v892_v23 = vpop.permute.xlu0 %891 }
 0x2e0   : > { %v894_v28 = vpop.permute.xlu1 %893  ;;  %v883_v51 = vadd.f32 %v881_v26, %v873_v34  ;;  %v884_v52 = vadd.f32 %v882_v27, %v874_v36 }
 0x2e1   : > { %v895_v29 = vsel %vm585_vm5, %v892_v23, %v894_v28  ;;  %v896_v30 = vsel %vm585_vm5, %v894_v28, %v892_v23 }
 0x2e2   : > { %v897_v38 = vmul.f32 %v896_v30, %v1666_v5  ;;  %v898_v20 = vmul.f32 %v895_v29, %v1669_v6 }
 0x2e3   : > { %v912_v39 = vpop.permute.xlu0 %911 }
 0x2e4   : > { %v914_v53 = vpop.permute.xlu1 %913  ;;  %v899_v56 = vadd.f32 %v897_v38, %v883_v51  ;;  %v900_v57 = vadd.f32 %v898_v20, %v884_v52 }
 0x2e5   : > { %v915_v58 = vsel %vm628_vm6, %v912_v39, %v914_v53  ;;  %v916_v61 = vsel %vm628_vm6, %v914_v53, %v912_v39 }
 0x2e6   : > { %v903_v42 = vadd.f32 %v901_v63, %v899_v56  ;;  %v904_v9 = vadd.f32 %v902_v0, %v900_v57  ;;  %v917_v11 = vmul.f32 %v915_v58, %v1686_v16  ;;  %v918_v12 = vmul.f32 %v916_v61, %v1689_v17  ;;  %v967_v56 = vld [vmem:[%s1977_s6] sm:$0xff]  ;;  %v968_v57 = vld [vmem:[%s1977_s6 + $0x8] sm:$0xff]  ;;  %v970_v58 = vld [vmem:[%s1977_s6 + $0x18] sm:$0xff] }
 0x2e7   : > { %v922_v31 = vpop.permute.xlu0 %921  ;;  %v971_v61 = vld [vmem:[%s1977_s6 + $0x20] sm:$0xf] }
 0x2e8   : > { %v924_v2 = vpop.permute.xlu1 %923  ;;  %v919_v49 = vadd.f32 %v917_v11, %v903_v42  ;;  %v920_v18 = vadd.f32 %v918_v12, %v904_v9 }
 0x2e9   : > { %v925_v4 = vsel %vm650_vm7, %v922_v31, %v924_v2  ;;  %v926_v7 = vsel %vm650_vm7, %v924_v2, %v922_v31 }
 0x2ea   : > { %v927_v14 = vmul.f32 %v925_v4, %v1708_v40  ;;  %v928_v21 = vmul.f32 %v926_v7, %v1711_v44 }
 0x2eb   : > { %v938_v13 = vpop.permute.xlu0 %937 }
 0x2ec   : > { %v940_v15 = vpop.permute.xlu1 %939  ;;  %v929_v24 = vadd.f32 %v927_v14, %v919_v49  ;;  %v930_v25 = vadd.f32 %v928_v21, %v920_v18  ;;  %v1207_v18 = vld [vmem:[#allocation2] sm:$0x1] }
 0x2ed   : > { %v941_v50 = vsel %vm678_vm8, %v938_v13, %v940_v15  ;;  %v942_v43 = vsel %vm678_vm8, %v940_v15, %v938_v13 }
 0x2ee   : > { %v943_v19 = vmul.f32 %v941_v50, %v1729_v59  ;;  %v944_v22 = vmul.f32 %v942_v43, %v1732_v60 }
 0x2ef   : > { %v950_v23 = vpop.permute.xlu0 %949 }
 0x2f0   : > { %v948_v26 = vpop.permute.xlu1 %947  ;;  %v945_v29 = vadd.f32 %v943_v19, %v929_v24  ;;  %v946_v30 = vadd.f32 %v944_v22, %v930_v25 }
 0x2f1   : > { %v951_v27 = vsel %vm700_vm9, %v948_v26, %v950_v23  ;;  %v952_v28 = vsel %vm700_vm9, %v950_v23, %v948_v26 }
 0x2f2   : > { %v953_v34 = vmul.f32 %v951_v27, %v1738_v33  ;;  %v954_v36 = vmul.f32 %v952_v28, %v1741_v62 }
 0x2f4   : > { %v955_v38 = vadd.f32 %v953_v34, %v945_v29  ;;  %v956_v20 = vadd.f32 %v954_v36, %v946_v30 }
 0x2f6   : > { %v963_v39 = vadd.f32 %v1805_v3, %v955_v38  ;;  %v964_v51 = vadd.f32 %v1805_v3, %v956_v20  ;;  %v969_v3 = vld [vmem:[%s1977_s6 + $0x10] sm:$0xff] }
 0x2f8   : > { %v965_v52 = vmax.f32 %v963_v39, 0.0  ;;  %v966_v53 = vmax.f32 %v964_v51, 0.0 }
 0x2fa   : > { %1403 = vmatprep.subr.msk.mxu0 %vm401_vm0, %v966_v53 }
 0x2fb   : > { %1404 = vmatpush1.msk.msra.mxu0 %vm401_vm0, %v965_v52 }
 0x2fc   : > { %1405 = vmatmul.mubr.msk.f32.vlgmr.msra.gmra.mrb[6].mxu0 %vm385_vm1, %v967_v56 }
 0x2fd   : > { %1063 = vmatprep.mubr.f32.mxu0 %v1448_v1 }
 0x300   : > { %1406 = vmatmul.mubr.msk.f32.gmra.mrb[8].mxu0 %vm385_vm1, %v968_v57 }
 0x301   : > { %1069 = vmatprep.mubr.f32.mxu0 %v1448_v1  ;;  %v1901_v19 = vpop.permute.xlu1 %1199 }
 0x304   : > { %1407 = vmatmul.mubr.msk.f32.gmra.mrb[10].mxu0 %vm385_vm1, %v969_v3 }
 0x305   : > { %1075 = vmatprep.mubr.f32.mxu0 %v1448_v1 }
 0x308   : > { %1408 = vmatmul.mubr.msk.f32.gmra.mrb[12].mxu0 %vm385_vm1, %v970_v58 }
 0x309   : > { %1081 = vmatprep.mubr.f32.mxu0 %v1448_v1 }
 0x30c   : > { %1409 = vmatmul.mubr.msk.f32.gmra.mrb[14].mxu0 %vm385_vm1, %v971_v61 }
 0x3cf   : > { %v1059_v31 = vpop.f32.mrb[6].mxu0 }
 0x3d0   : > { %1088 = vrot.lane.b32.xlu1 %v1059_v31, %s1450_s30  ;;  %v1061_v63 = vpop.f32.mrb[7].mxu0  ;;  %v1100_v0 = vrot.slane %v1059_v31, 4 }
 0x3d1   : > { %1090 = vrot.lane.b32.xlu0 %v1061_v63, %s1450_s30  ;;  %v1101_v2 = vrot.slane %v1061_v63, 4 }
 0x3d3   : > { %v1065_v4 = vpop.f32.mrb[8].mxu0 }
 0x3d4   : > { %1104 = vrot.lane.b32.xlu1 %v1100_v0, %s1452_s12  ;;  %v1067_v7 = vpop.f32.mrb[9].mxu0  ;;  %v1126_v9 = vrot.slane %v1065_v4, 4 }
 0x3d5   : > { %1106 = vrot.lane.b32.xlu0 %v1101_v2, %s1452_s12  ;;  %v1127_v11 = vrot.slane %v1067_v7, 4  ;;  %s1380_s12 = sshll.u32 %s1983_s16, 1 }
 0x3d7   : > { %v1071_v1 = vpop.f32.mrb[10].mxu0 }
 0x3d8   : > { %1114 = vrot.lane.b32.xlu1 %v1065_v4, %s1454_s14  ;;  %v1073_v42 = vpop.f32.mrb[11].mxu0  ;;  %v1146_v13 = vrot.slane %v1071_v1, 4 }
 0x3d9   : > { %1116 = vrot.lane.b32.xlu0 %v1067_v7, %s1454_s14  ;;  %v1147_v21 = vrot.slane %v1073_v42, 4 }
 0x3db   : > { %v1077_v12 = vpop.f32.mrb[12].mxu0 }
 0x3dc   : > { %1130 = vrot.lane.b32.xlu1 %v1126_v9, %s1455_s9  ;;  %v1079_v14 = vpop.f32.mrb[13].mxu0  ;;  %v1172_v43 = vrot.slane %v1077_v12, 4 }
 0x3dd   : > { %1132 = vrot.lane.b32.xlu0 %v1127_v11, %s1455_s9  ;;  %v1173_v49 = vrot.slane %v1079_v14, 4  ;;  %v1140_v11 = vmul.f32 %v1071_v1, %v1675_v8  ;;  %s359_s9 = scalar_lea.vmem %s1981_s10, %s1380_s12 }
 0x3df   : > { %v1083_v15 = vpop.f32.mrb[14].mxu0 }
 0x3e0   : > { %1150 = vrot.lane.b32.xlu1 %v1146_v13, %s1456_s17  ;;  %v1085_v50 = vpop.f32.mrb[15].mxu0 }
 0x3e1   : > { %1152 = vrot.lane.b32.xlu0 %v1147_v21, %s1456_s17 }
 0x3e4   : > { %1160 = vrot.lane.b32.xlu1 %v1077_v12, %s1451_s11  ;;  %v1141_v12 = vmul.f32 %v1073_v42, %v1678_v10 }
 0x3e5   : > { %1162 = vrot.lane.b32.xlu0 %v1079_v14, %s1451_s11 }
 0x3e8   : > { %1176 = vrot.lane.b32.xlu1 %v1172_v43, %s1453_s13 }
 0x3e9   : > { %1178 = vrot.lane.b32.xlu0 %v1173_v49, %s1453_s13 }
 0x3ec   : > { %1188 = vrot.lane.b32.xlu1 %v1085_v50, %s1457_s20 }
 0x3ed   : > { %1186 = vrot.lane.b32.xlu0 %v1083_v15, %s1457_s20 }
 0x3f1   : > { %1210 = vperm.xlu0 %1437, %v1207_v18  }
 0x442   : > { %v1089_v22 = vpop.permute.xlu1 %1088 }
 0x443   : > { %v1091_v23 = vpop.permute.xlu0 %1090 }
 0x444   : > { %v1092_v30 = vsel %vm507_vm2, %v1089_v22, %v1091_v23  ;;  %v1093_v34 = vsel %vm507_vm2, %v1091_v23, %v1089_v22 }
 0x445   : > { %v1094_v52 = vmul.f32 %v1093_v34, %v1620_v45  ;;  %v1095_v53 = vmul.f32 %v1092_v30, %v1623_v46 }
 0x446   : > { %v1105_v24 = vpop.permute.xlu1 %1104 }
 0x447   : > { %v1107_v25 = vpop.permute.xlu0 %1106 }
 0x448   : > { %v1108_v26 = vsel %vm535_vm3, %v1105_v24, %v1107_v25  ;;  %v1109_v27 = vsel %vm535_vm3, %v1107_v25, %v1105_v24 }
 0x449   : > { %v1110_v20 = vmul.f32 %v1109_v27, %v1626_v47  ;;  %v1111_v39 = vmul.f32 %v1108_v26, %v1629_v48 }
 0x44a   : > { %v1115_v28 = vpop.permute.xlu1 %1114 }
 0x44b   : > { %v1117_v29 = vpop.permute.xlu0 %1116  ;;  %v1112_v31 = vadd.f32 %v1110_v20, %v1094_v52  ;;  %v1113_v47 = vadd.f32 %v1111_v39, %v1095_v53 }
 0x44c   : > { %v1118_v36 = vsel %vm557_vm4, %v1115_v28, %v1117_v29  ;;  %v1119_v38 = vsel %vm557_vm4, %v1117_v29, %v1115_v28 }
 0x44d   : > { %v1120_v56 = vmul.f32 %v1119_v38, %v1643_v54  ;;  %v1121_v57 = vmul.f32 %v1118_v36, %v1646_v55 }
 0x44e   : > { %v1131_v51 = vpop.permute.xlu1 %1130 }
 0x44f   : > { %v1133_v3 = vpop.permute.xlu0 %1132  ;;  %v1122_v0 = vadd.f32 %v1120_v56, %v1112_v31  ;;  %v1123_v46 = vadd.f32 %v1121_v57, %v1113_v47 }
 0x450   : > { %v1134_v58 = vsel %vm585_vm5, %v1131_v51, %v1133_v3  ;;  %v1135_v61 = vsel %vm585_vm5, %v1133_v3, %v1131_v51 }
 0x451   : > { %v1136_v48 = vmul.f32 %v1135_v61, %v1666_v5  ;;  %v1137_v63 = vmul.f32 %v1134_v58, %v1669_v6 }
 0x452   : > { %v1151_v45 = vpop.permute.xlu1 %1150 }
 0x453   : > { %v1153_v2 = vpop.permute.xlu0 %1152  ;;  %v1138_v54 = vadd.f32 %v1136_v48, %v1122_v0  ;;  %v1139_v4 = vadd.f32 %v1137_v63, %v1123_v46 }
 0x454   : > { %v1154_v55 = vsel %vm628_vm6, %v1151_v45, %v1153_v2  ;;  %v1155_v7 = vsel %vm628_vm6, %v1153_v2, %v1151_v45 }
 0x455   : > { %v1142_v14 = vadd.f32 %v1140_v11, %v1138_v54  ;;  %v1143_v21 = vadd.f32 %v1141_v12, %v1139_v4  ;;  %v1156_v15 = vmul.f32 %v1154_v55, %v1686_v16  ;;  %v1157_v50 = vmul.f32 %v1155_v7, %v1689_v17 }
 0x456   : > { %v1161_v9 = vpop.permute.xlu1 %1160 }
 0x457   : > { %v1163_v5 = vpop.permute.xlu0 %1162  ;;  %v1158_v18 = vadd.f32 %v1156_v15, %v1142_v14  ;;  %v1159_v22 = vadd.f32 %v1157_v50, %v1143_v21 }
 0x458   : > { %v1164_v6 = vsel %vm650_vm7, %v1161_v9, %v1163_v5  ;;  %v1165_v13 = vsel %vm650_vm7, %v1163_v5, %v1161_v9 }
 0x459   : > { %v1166_v49 = vmul.f32 %v1164_v6, %v1708_v40  ;;  %v1167_v8 = vmul.f32 %v1165_v13, %v1711_v44 }
 0x45a   : > { %v1177_v43 = vpop.permute.xlu1 %1176 }
 0x45b   : > { %v1179_v1 = vpop.permute.xlu0 %1178  ;;  %v1168_v17 = vadd.f32 %v1166_v49, %v1158_v18  ;;  %v1169_v25 = vadd.f32 %v1167_v8, %v1159_v22 }
 0x45c   : > { %v1180_v10 = vsel %vm678_vm8, %v1177_v43, %v1179_v1  ;;  %v1181_v42 = vsel %vm678_vm8, %v1179_v1, %v1177_v43 }
 0x45d   : > { %v1182_v23 = vmul.f32 %v1180_v10, %v1729_v59  ;;  %v1183_v16 = vmul.f32 %v1181_v42, %v1732_v60 }
 0x45e   : > { %v1189_v24 = vpop.permute.xlu1 %1188 }
 0x45f   : > { %v1187_v26 = vpop.permute.xlu0 %1186  ;;  %v1184_v27 = vadd.f32 %v1182_v23, %v1168_v17  ;;  %v1185_v28 = vadd.f32 %v1183_v16, %v1169_v25 }
 0x460   : > { %v1190_v40 = vsel %vm700_vm9, %v1187_v26, %v1189_v24  ;;  %v1191_v44 = vsel %vm700_vm9, %v1189_v24, %v1187_v26 }
 0x461   : > { %v1192_v29 = vmul.f32 %v1190_v40, %v1738_v33  ;;  %v1193_v30 = vmul.f32 %v1191_v44, %v1741_v62  ;;  %v1458_v33 = vmov 1966171168  }
 0x462   : > { %v1301_v62 = vunpack.c.l.s4 %v1458_v33 }
 0x463   : > { %v1194_v34 = vadd.f32 %v1192_v29, %v1184_v27  ;;  %v1195_v59 = vadd.f32 %v1193_v30, %v1185_v28 }
 0x464   : > { %v1302_v51 = vunpack.c.0.s8 %v1301_v62 }
 0x465   : > { %v1202_v60 = vadd.f32 %v1901_v19, %v1194_v34  ;;  %v1203_v36 = vadd.f32 %v1901_v19, %v1195_v59 }
 0x466   : > { %v1305_v3 = vsub.s32 %v1302_v51, %v1595_v35 }
 0x467   : > { %v1204_v38 = vmax.f32 %v1202_v60, 0.0  ;;  %v1205_v20 = vmax.f32 %v1203_v36, 0.0 }
 0x469   : > { %1410 = vmatprep.subr.msk.mxu1 %vm401_vm0, %v1205_v20 }
 0x46a   : > { %1411 = vmatpush1.msk.msra.mxu1 %vm401_vm0, %v1204_v38 }
 0x46b   : > { %1412 = vmatmul.mubr.msk.f32.vlgmr.msra.gmra.mrb[14].mxu1 %vm385_vm1, %v1206_v37 }
 0x470   : > { %v1211_v39 = vpop.permute.xlu0 %1210 }
 0x471   : > { %v1216_v52 = vrot.slane %v1211_v39, %v1607_v41 }
 0x53e   : > { %v1292_v19 = vpop.f32.mrb[14].mxu1 }
 0x53f   : > { %v1293_v53 = vadd.f32 %v1292_v19, %v1216_v52  ;;  %v1294_v56 = vpop.f32.mrb[15].mxu1 }
 0x540   : > { %v1295_v57 = vadd.f32 %v1294_v56, %v1216_v52 }
 0x542   : > { %v1299_v58 = vcombine.low %v1293_v53, %v1295_v57 }
 0x544   : > { %v1306_v61 = vrot.slane %v1299_v58, %v1305_v3 }
 0x546   : > { %v1313_v31 = vrot.slane %v1306_v61, %v1305_v3 }
 0x548   : > { %1319 = vst.msk [vmem:[%s359_s9] sm:$0x3] %vm1317_vm10, %v1313_v31 }
 0x549 PF: > { %s22_s15 = sadd.s32 1, %s1446_s15  }
 0x54a   : > { %p19_p4 = scmp.ge.s32.totalorder %s22_s15, 4  }
 0x54c   :  { %21 = sbr.rel (!%p19_p4) target bundleno = 3 (0x3), region = 98 }

</bundles_post_ra>
